<compile_context>
chip_gen: v5e
topology: v5e:2x2
jax: 0.10.0
libtpu: 0.0.40
codegen_flags: <defaults>
</compile_context>

<pallas_src>
import jax
import jax.numpy as jnp
from jax.experimental import pallas as pl
from jax.experimental.pallas import tpu as pltpu


def _linear_kernel(x_ref, w_ref, b_ref, o_ref):
    # x_ref: (B, IN)   activations, VMEM
    # w_ref: (OUT, IN) weight in original PyTorch layout, SMEM (scalar reads)
    # b_ref: (OUT,)    bias, SMEM (scalar reads)
    # o_ref: (B, OUT)  output, VMEM
    x = x_ref[...].astype(jnp.float32)
    batch, in_features = x.shape
    out_features = o_ref.shape[1]

    # Tiny static contraction, fully unrolled at trace time.
    # y[:, o] = b[o] + sum_k x[:, k] * w[o, k]
    # Scalar (SMEM) x vector (VMEM) broadcasts -> pure VPU FMAs, no transpose,
    # no lane/sublane relayout anywhere.
    cols = []
    for o in range(out_features):
        acc = jnp.full((batch, 1), b_ref[o], dtype=jnp.float32)  # bias-init accumulator
        for k in range(in_features):
            acc = acc + x[:, k:k + 1] * w_ref[o, k]
        cols.append(acc)

    o_ref[...] = jnp.concatenate(cols, axis=1).astype(o_ref.dtype)


@jax.jit
def linear_pallas(x, w, b):
    """y = x @ w.T + b   (PyTorch nn.Linear semantics).

    x: (B, IN), w: (OUT, IN) PyTorch layout (NOT transposed), b: (OUT,)
    """
    B, IN = x.shape
    OUT, IN_w = w.shape
    assert IN == IN_w
    assert b.shape == (OUT,)

    # No grid: single invocation. Activations/output as whole-array VMEM
    # blocks; the tiny weight/bias go to SMEM for scalar indexing so the
    # original PyTorch layout needs no prep op at all.
    return pl.pallas_call(
        _linear_kernel,
        out_shape=jax.ShapeDtypeStruct((B, OUT), x.dtype),
        in_specs=[
            pl.BlockSpec(memory_space=pltpu.MemorySpace.VMEM),   # x
            pl.BlockSpec(memory_space=pltpu.MemorySpace.SMEM),   # w (OUT, IN)
            pl.BlockSpec(memory_space=pltpu.MemorySpace.SMEM),   # b (OUT,)
        ],
        out_specs=pl.BlockSpec(memory_space=pltpu.MemorySpace.VMEM),
    )(x, w, b)


if __name__ == "__main__":
    key = jax.random.PRNGKey(0)
    kx, kw, kb = jax.random.split(key, 3)

    batch, in_features, out_features = 2, 2, 2

    # Deterministic parameter init (PyTorch Linear default: U(-1/sqrt(in), 1/sqrt(in)))
    bound = 1.0 / jnp.sqrt(in_features)
    w = jax.random.uniform(kw, (out_features, in_features),
                           minval=-bound, maxval=bound, dtype=jnp.float32)
    b = jax.random.uniform(kb, (out_features,),
                           minval=-bound, maxval=bound, dtype=jnp.float32)

    x = jax.random.normal(kx, (batch, in_features), dtype=jnp.float32)

    y = linear_pallas(x, w, b)
    jax.block_until_ready(y)

    # Reference check against plain JAX
    y_ref = x @ w.T + b
    assert y.shape == (batch, out_features)
    assert jnp.allclose(y, y_ref, atol=1e-5, rtol=1e-5), (y, y_ref)

    print("KERNEL_OK")
</pallas_src>

<mosaic_0001>
module attributes {stable_mosaic.version = 11 : i64} {
  func.func @_linear_kernel(%arg0: memref<2x2xf32, #tpu.memory_space<vmem>>, %arg1: memref<2x2xf32, #tpu.memory_space<smem>>, %arg2: memref<2xf32, #tpu.memory_space<smem>>, %arg3: memref<2x2xf32, #tpu.memory_space<vmem>>) attributes {dimension_semantics = [], scalar_prefetch = 0 : i64, scratch_operands = 0 : i64, tpu.core_type = #tpu.core_type<tc>} {
    %c0 = arith.constant 0 : index
    %c0_0 = arith.constant 0 : index
    %0 = vector.load %arg0[%c0, %c0_0] : memref<2x2xf32, #tpu.memory_space<vmem>>, vector<2x2xf32>
    %c0_1 = arith.constant 0 : index
    %1 = memref.load %arg2[%c0_1] : memref<2xf32, #tpu.memory_space<smem>>
    %2 = vector.broadcast %1 : f32 to vector<2x1xf32>
    %3 = vector.extract_strided_slice %0 {offsets = [0, 0], sizes = [2, 1], strides = [1, 1]} : vector<2x2xf32> to vector<2x1xf32>
    %c0_2 = arith.constant 0 : index
    %c0_3 = arith.constant 0 : index
    %4 = memref.load %arg1[%c0_2, %c0_3] : memref<2x2xf32, #tpu.memory_space<smem>>
    %5 = vector.broadcast %4 : f32 to vector<2x1xf32>
    %6 = arith.mulf %3, %5 : vector<2x1xf32>
    %7 = arith.addf %2, %6 : vector<2x1xf32>
    %8 = vector.extract_strided_slice %0 {offsets = [0, 1], sizes = [2, 1], strides = [1, 1]} : vector<2x2xf32> to vector<2x1xf32>
    %c0_4 = arith.constant 0 : index
    %c1 = arith.constant 1 : index
    %9 = memref.load %arg1[%c0_4, %c1] : memref<2x2xf32, #tpu.memory_space<smem>>
    %10 = vector.broadcast %9 : f32 to vector<2x1xf32>
    %11 = arith.mulf %8, %10 : vector<2x1xf32>
    %12 = arith.addf %7, %11 : vector<2x1xf32>
    %c1_5 = arith.constant 1 : index
    %13 = memref.load %arg2[%c1_5] : memref<2xf32, #tpu.memory_space<smem>>
    %14 = vector.broadcast %13 : f32 to vector<2x1xf32>
    %15 = vector.extract_strided_slice %0 {offsets = [0, 0], sizes = [2, 1], strides = [1, 1]} : vector<2x2xf32> to vector<2x1xf32>
    %c1_6 = arith.constant 1 : index
    %c0_7 = arith.constant 0 : index
    %16 = memref.load %arg1[%c1_6, %c0_7] : memref<2x2xf32, #tpu.memory_space<smem>>
    %17 = vector.broadcast %16 : f32 to vector<2x1xf32>
    %18 = arith.mulf %15, %17 : vector<2x1xf32>
    %19 = arith.addf %14, %18 : vector<2x1xf32>
    %20 = vector.extract_strided_slice %0 {offsets = [0, 1], sizes = [2, 1], strides = [1, 1]} : vector<2x2xf32> to vector<2x1xf32>
    %c1_8 = arith.constant 1 : index
    %c1_9 = arith.constant 1 : index
    %21 = memref.load %arg1[%c1_8, %c1_9] : memref<2x2xf32, #tpu.memory_space<smem>>
    %22 = vector.broadcast %21 : f32 to vector<2x1xf32>
    %23 = arith.mulf %20, %22 : vector<2x1xf32>
    %24 = arith.addf %19, %23 : vector<2x1xf32>
    %25 = tpu.concatenate %12, %24 in 1 : vector<2x1xf32>, vector<2x1xf32> -> vector<2x2xf32>
    %c0_10 = arith.constant 0 : index
    %c0_11 = arith.constant 0 : index
    %26 = vector.load %arg3[%c0_10, %c0_11] : memref<2x2xf32, #tpu.memory_space<vmem>>, vector<2x2xf32>
    tpu.vector_store %arg3[%c0_10, %c0_11], %25 {strides = array<i32>} : memref<2x2xf32, #tpu.memory_space<vmem>>, vector<2x2xf32>,
    return
  }
}

</mosaic_0001>

<bundles_post_ra>
// kernel: linear_pallas.1
= control target key start
LH: loop header
LB: loop body
LE: loop exit
PB: predicated region body
PF: predicated region fallthrough
CT: control target
= control target key end

     0   :  { %8 = vsyncpa [#allocation3], 0  ;;  %s238_s0 = inlined_call_operand.hbm [shape: f32[2,2], index: 0, kind: input, shape index: {}]   ;;  %s239_s1 = inlined_call_operand.hbm [shape: f32[2,2], index: 1, kind: input, shape index: {}]   ;;  %s240_s2 = inlined_call_operand.vmem [shape: f32[2], index: 2, kind: input, shape index: {}]   ;;  %s241_s3 = inlined_call_operand.hbm [shape: f32[2,2], index: 3, kind: output, shape index: {}]  }
   0x1   :  { %9 = vsyncpa [#allocation5], 0 }
   0x2   :  { %10 = vsyncpa [#allocation6], 0 }
   0x3   :  { %11 = vsyncpa [#allocation4], 0  ;;  %s17_s14 = sshll.u32 %s238_s0, 4  ;;  %s200_s15 = smov [#allocation2]   ;;  %s18_s14 = int_to_ptr.hbm [resolvable:$true] %s17_s14 }
   0x4   :  { %s19_s16 = sshll.u32 %s200_s15, 4  ;;  %s28_s19 = sshll.u32 %s239_s1, 4  ;;  %s20_s16 = int_to_ptr.vmem [resolvable:$true] %s19_s16  ;;  %s29_s19 = int_to_ptr.hbm [resolvable:$true] %s28_s19 }
   0x5   :  { %22 = dma.hbm_to_vmem [thread:$0]  %s18_s14, 32, %s20_s16, [#allocation3]  }
   0x6   :  { %s201_s20 = smov [#allocation7]   ;;  %s37_s23 = sshll.u32 %s240_s2, 4  ;;  %s38_s23 = int_to_ptr.vmem [resolvable:$true] %s37_s23 }
   0x7   :  { %31 = dma.hbm_to_smem %s29_s19, 32, %s201_s20, [#allocation5]  }
   0x8   :  { %s202_s24 = smov [#allocation8]  }
   0x9   :  { %40 = dma.vmem_to_smem %s38_s23, 16, %s202_s24, [#allocation6]  }
   0xa   :  { %192 = dma.done.wait [#allocation3], 32  }
   0xb   :  { %193 = vsyncadd [#allocation3], 4294967264 }
   0xc   :  { %194 = dma.done.wait [#allocation5], 32  }
   0xd   :  { %195 = vsyncadd [#allocation5], 4294967264 }
   0xe   :  { %196 = dma.done.wait [#allocation6], 16  }
   0xf   :  { %197 = vsyncadd [#allocation6], 4294967280 }
  0x10   :  { %53 = sfence }
  0x11   :  { %s113_s0 = sld [smem:[#allocation7 + $0x81]]  ;;  %v54_v0 = vld [vmem:[#allocation2] sm:$0x3]  ;;  %s203_s1 = smov 127   ;;  %vm87_vm0 = vcmask 7168   ;;  %vm89_vm1 = vcmask 9216  }
  0x12   :  { %s110_s25 = sld [smem:[#allocation7 + $0x1]]  ;;  %s204_s27 = smov 1  }
  0x13   :  { %s112_s2 = sld [smem:[#allocation7 + $0x80]]  ;;  %s205_s30 = smov [#allocation9]  }
  0x14   :  { %s111_s26 = sld [smem:[#allocation8 + $0x1]]  ;;  %s96_s4 = sshll.u32 %s205_s30, 4  ;;  %s97_s4 = int_to_ptr.vmem [resolvable:$true] %s96_s4 }
  0x15   :  { %s57_s28 = sld [smem:[#allocation7]]  ;;  %s98_s7 = sshll.u32 %s241_s3, 4  ;;  %s99_s7 = int_to_ptr.hbm [resolvable:$true] %s98_s7 }
  0x16   :  { %s55_s29 = sld [smem:[#allocation8]] }
  0x17   :  { %v76_v1 = vstv %s113_s0 }
  0x18   :  { %v77_v2 = vmul.f32 %v76_v1, %v54_v0  ;;  %v62_v3 = vstv %s110_s25 }
  0x19   :  { %v63_v4 = vmul.f32 %v62_v3, %v54_v0  ;;  %v72_v5 = vstv %s112_s2 }
  0x1a   :  { %79 = vrot.lane.b32.xlu0 %v77_v2, %s203_s1  ;;  %v73_v6 = vmul.f32 %v72_v5, %v54_v0  ;;  %v70_v7 = vstv %s111_s26 }
  0x1b   :  { %v58_v11 = vstv %s57_s28 }
  0x1c   :  { %v74_v8 = vadd.f32 %v73_v6, %v70_v7  ;;  %v59_v12 = vmul.f32 %v58_v11, %v54_v0  ;;  %v56_v13 = vstv %s55_s29 }
  0x1e   :  { %v60_v14 = vadd.f32 %v59_v12, %v56_v13 }
  0x22   :  { %65 = vrot.lane.b32.xlu0 %v63_v4, %s203_s1 }
  0x8c   :  { %v80_v9 = vpop.permute.xlu0 %79 }
  0x8d   :  { %v82_v10 = vadd.f32 %v80_v9, %v74_v8 }
  0x8f   :  { %84 = vrot.lane.b32.xlu1 %v82_v10, %s204_s27 }
  0x94   :  { %v66_v15 = vpop.permute.xlu0 %65 }
  0x95   :  { %v68_v16 = vadd.f32 %v66_v15, %v60_v14 }
 0x101   :  { %v85_v17 = vpop.permute.xlu1 %84 }
 0x102   :  { %v88_v18 = vsel %vm87_vm0, %v68_v16, %v85_v17 }
 0x103   :  { %90 = vst.msk [vmem:[#allocation9] sm:$0x3] %vm89_vm1, %v88_v18 }
 0x104   :  { %101 = dma.vmem_to_hbm [thread:$0]  %s97_s4, 32, %s99_s7, [#allocation4]  }
 0x105   :  { %198 = dma.done.wait [#allocation4], 32  }
 0x106   :  { %199 = vsyncadd [#allocation4], 4294967264 }
 0x107   :  { %106 = vsyncpa [#allocation3], 1 }
 0x108   :  { %107 = vsyncpa [#allocation4], 1 }
 0x109   :  { %108 = vsyncpa [#allocation5], 1 }
 0x10a   :  { %109 = vsyncpa [#allocation6], 1 }

</bundles_post_ra>
